<compile_context>
chip_gen: v6e
topology: v6e:2x2x1
jax: 0.10.0
libtpu: 0.0.40
codegen_flags: <defaults>
</compile_context>

<pallas_src>
import functools

import jax
import jax.numpy as jnp
from jax.experimental import pallas as pl
from jax.experimental.pallas import tpu as pltpu


def _round_up(x: int, m: int) -> int:
    return ((x + m - 1) // m) * m


def _pick_tile(padded_dim: int, candidates) -> int:
    """Largest candidate that exactly divides padded_dim (padded_dim % 128 == 0)."""
    for c in candidates:
        if c <= padded_dim and padded_dim % c == 0:
            return c
    return 128


# ---------------------------------------------------------------------------
# Kernels
# ---------------------------------------------------------------------------
def _linear_kernel_inplace(x_ref, w_ref, b_ref, o_ref):
    """f32 output: accumulate directly into the k-resident output block."""
    k = pl.program_id(2)

    @pl.when(k == 0)
    def _():
        o_ref[...] = jnp.broadcast_to(b_ref[...], o_ref.shape)

    o_ref[...] += jnp.dot(
        x_ref[...], w_ref[...], preferred_element_type=jnp.float32
    )


def _linear_kernel_acc(x_ref, w_ref, b_ref, o_ref, acc_ref):
    """Low-precision output: f32 VMEM accumulator, cast + store on last k step."""
    k = pl.program_id(2)

    @pl.when(k == 0)
    def _():
        acc_ref[...] = jnp.broadcast_to(b_ref[...], acc_ref.shape)

    acc_ref[...] += jnp.dot(
        x_ref[...], w_ref[...], preferred_element_type=jnp.float32
    )

    @pl.when(k == pl.num_programs(2) - 1)
    def _():
        o_ref[...] = acc_ref[...].astype(o_ref.dtype)


# ---------------------------------------------------------------------------
# Parameter preparation (runs once, OUTSIDE the jitted forward)
# ---------------------------------------------------------------------------
def prepare_linear_params(weight_t, bias, param_dtype=None):
    """Pad weight_t [K, N] -> [Kp, Np] and bias -> f32 [1, Np] once at init time.

    Keeping this out of the hot path avoids re-materializing a full K x N copy of
    the weight in HBM on every forward call.  `param_dtype=jnp.bfloat16` enables
    bf16 weight streaming (f32 accumulation is kept inside the kernel).
    """
    K, N = weight_t.shape
    Kp, Np = _round_up(K, 128), _round_up(N, 128)
    w_p = weight_t
    if (Kp, Np) != (K, N):
        w_p = jnp.pad(w_p, ((0, Kp - K), (0, Np - N)))
    if param_dtype is not None:
        w_p = w_p.astype(param_dtype)
    b_p = bias.reshape(1, -1).astype(jnp.float32)
    if Np != N:
        b_p = jnp.pad(b_p, ((0, 0), (0, Np - N)))
    return w_p, b_p


# ---------------------------------------------------------------------------
# Forward
# ---------------------------------------------------------------------------
@functools.partial(jax.jit, static_argnames=("n_out",))
def linear_forward(x, w_p, b_p, n_out):
    """y = x @ weight_t + bias with pre-padded params.

    x    : [M, K]                (K <= Kp)
    w_p  : [Kp, Np]              (pre-padded, possibly bf16)
    b_p  : [1, Np] float32       (pre-padded)
    n_out: original output_size  (static)
    """
    M, K = x.shape
    Kp, Np = w_p.shape
    assert K <= Kp and n_out <= Np
    out_dtype = x.dtype

    # Cast x to the weight's dtype (bf16 streaming path); accumulation stays f32.
    compute_dtype = w_p.dtype
    if x.dtype != compute_dtype:
        x = x.astype(compute_dtype)

    # Sublane granularity: 8 for 32-bit, 16 for packed sub-32-bit dtypes.
    sub = 8 if jnp.dtype(compute_dtype).itemsize == 4 else 16

    # Tile selection: lane-dense, exact divisors of the padded dims (no masking).
    tm = min(512, _round_up(M, sub))
    tk = _pick_tile(Kp, (1024, 896, 768, 640, 512, 384, 256, 128))
    tn = _pick_tile(Np, (512, 384, 256, 128))
    # Feed both v7x TensorCores when the i axis has a single block.
    if _round_up(M, tm) // tm == 1 and Np // tn < 2 and Np >= 256:
        tn = 128

    Mp = _round_up(M, tm)

    # Only x (the small operand) may need per-call padding; skip when aligned.
    if (Mp, Kp) != (M, K):
        x = jnp.pad(x, ((0, Mp - M), (0, Kp - K)))

    grid = (Mp // tm, Np // tn, Kp // tk)
    use_scratch = out_dtype != jnp.float32

    xb = jnp.dtype(compute_dtype).itemsize
    ob = jnp.dtype(out_dtype).itemsize
    # Double-buffered live footprint + optional accumulator; explicit VMEM limit
    # sized from it, capped at 48 MiB so it is safe on v7x (64 MiB physical) too.
    tile_bytes = 2 * (tm * tk * xb + tk * tn * xb + tm * tn * ob + tn * 4)
    if use_scratch:
        tile_bytes += tm * tn * 4
    vmem_limit = int(min(max(2 * tile_bytes, 32 << 20), 48 << 20))

    cost = pl.CostEstimate(
        flops=2 * Mp * Np * Kp,
        transcendentals=0,
        bytes_accessed=(
            Mp * Kp * xb * (Np // tn)      # x streamed once per j block
            + Kp * Np * xb * (Mp // tm)    # weight streamed once per i block
            + Np * 4                       # bias (f32)
            + Mp * Np * ob                 # output writeback
        ),
    )

    kernel = _linear_kernel_acc if use_scratch else _linear_kernel_inplace
    scratch = [pltpu.VMEM((tm, tn), jnp.float32)] if use_scratch else []

    out_p = pl.pallas_call(
        kernel,
        out_shape=jax.ShapeDtypeStruct((Mp, Np), out_dtype),
        grid_spec=pltpu.PrefetchScalarGridSpec(
            num_scalar_prefetch=0,
            grid=grid,
            in_specs=[
                pl.BlockSpec((tm, tk), lambda i, j, k: (i, k)),  # x tile
                pl.BlockSpec((tk, tn), lambda i, j, k: (k, j)),  # weight tile
                pl.BlockSpec((1, tn), lambda i, j, k: (0, j)),   # bias tile (j only)
            ],
            out_specs=pl.BlockSpec((tm, tn), lambda i, j, k: (i, j)),
            scratch_shapes=scratch,
        ),
        compiler_params=pltpu.CompilerParams(
            dimension_semantics=("parallel", "parallel", "arbitrary"),
            vmem_limit_bytes=vmem_limit,
        ),
        cost_estimate=cost,
    )(x, w_p, b_p)

    if (Mp, Np) != (M, n_out):
        out_p = out_p[:M, :n_out]
    return out_p


def init_linear_params(key, input_size, output_size, dtype=jnp.float32):
    """Deterministic init mimicking nn.Linear's uniform(-1/sqrt(in), 1/sqrt(in))."""
    kw, kb = jax.random.split(key)
    bound = 1.0 / jnp.sqrt(jnp.float32(input_size))
    # PyTorch stores weight as [output_size, input_size]; keep the transpose
    # [input_size, output_size] so the kernel does x @ weight_t directly.
    weight_t = jax.random.uniform(
        kw, (input_size, output_size), dtype=dtype, minval=-bound, maxval=bound
    )
    bias = jax.random.uniform(
        kb, (1, output_size), dtype=dtype, minval=-bound, maxval=bound
    )
    return weight_t, bias


if __name__ == "__main__":
    # Small shapes consistent with the module: batch=8, input_size=32, output_size=16.
    batch, input_size, output_size = 8, 32, 16

    key = jax.random.PRNGKey(0)
    kx, kp = jax.random.split(key)

    x = jax.random.normal(kx, (batch, input_size), dtype=jnp.float32)
    weight_t, bias = init_linear_params(kp, input_size, output_size)

    # Pad the params ONCE (outside jit), then run the kernel.
    w_p, b_p = prepare_linear_params(weight_t, bias)
    y = jax.block_until_ready(linear_forward(x, w_p, b_p, output_size))

    y_ref = x @ weight_t + bias
    assert y.shape == (batch, output_size)
    assert jnp.allclose(y, y_ref, atol=1e-5, rtol=1e-5)

    # Larger, tile-spanning shape exercising the (i, j, k) grid path (f32).
    M2, K2, N2 = 384, 640, 300  # deliberately non-multiples of 128
    kx2, kw2, kb2 = jax.random.split(jax.random.PRNGKey(1), 3)
    x2 = jax.random.normal(kx2, (M2, K2), dtype=jnp.float32)
    w2 = jax.random.normal(kw2, (K2, N2), dtype=jnp.float32) * 0.05
    b2 = jax.random.normal(kb2, (1, N2), dtype=jnp.float32)
    w2_p, b2_p = prepare_linear_params(w2, b2)
    y2 = jax.block_until_ready(linear_forward(x2, w2_p, b2_p, N2))
    y2_ref = x2 @ w2 + b2
    assert jnp.allclose(y2, y2_ref, atol=1e-3, rtol=1e-4)

    # bf16 weight-streaming path (halves weight HBM bytes; f32 MXU accumulation).
    w3_p, b3_p = prepare_linear_params(w2, b2, param_dtype=jnp.bfloat16)
    y3 = jax.block_until_ready(linear_forward(x2, w3_p, b3_p, N2))
    assert jnp.allclose(y3, y2_ref, atol=0.15, rtol=0.05)

    print("KERNEL_OK")
</pallas_src>

<mosaic_0001>
module attributes {stable_mosaic.version = 11 : i64} {
  func.func @_linear_kernel_inplace(%arg0: i32, %arg1: i32, %arg2: i32, %arg3: memref<8x128xf32, #tpu.memory_space<vmem>>, %arg4: memref<128x128xf32, #tpu.memory_space<vmem>>, %arg5: memref<1x128xf32, #tpu.memory_space<vmem>>, %arg6: memref<8x128xf32, #tpu.memory_space<vmem>>) attributes {dimension_semantics = [#tpu.dimension_semantics<parallel>, #tpu.dimension_semantics<parallel>, #tpu.dimension_semantics<arbitrary>], iteration_bounds = array<i64: 1, 1, 1>, scalar_prefetch = 0 : i64, scratch_operands = 0 : i64, tpu.core_type = #tpu.core_type<tc>, window_params = [{transform_indices = @transform_0, window_bounds = array<i64: 8, 128>}, {transform_indices = @transform_1, window_bounds = array<i64: 128, 128>}, {transform_indices = @transform_2, window_bounds = array<i64: 1, 128>}, {transform_indices = @transform_3, window_bounds = array<i64: 8, 128>}]} {
    %c0_i32 = arith.constant 0 : i32
    %0 = arith.cmpi eq, %arg2, %c0_i32 : i32
    %1 = arith.extui %0 : i1 to i32
    %c0_i32_0 = arith.constant 0 : i32
    %2 = arith.cmpi ne, %1, %c0_i32_0 : i32
    scf.if %2 {
      %c0_8 = arith.constant 0 : index
      %c0_9 = arith.constant 0 : index
      %9 = vector.load %arg5[%c0_8, %c0_9] : memref<1x128xf32, #tpu.memory_space<vmem>>, vector<1x128xf32>
      %10 = vector.shape_cast %9 : vector<1x128xf32> to vector<1x128xf32>
      %11 = vector.broadcast %10 : vector<1x128xf32> to vector<8x128xf32>
      %c0_10 = arith.constant 0 : index
      %c0_11 = arith.constant 0 : index
      %12 = vector.load %arg6[%c0_10, %c0_11] : memref<8x128xf32, #tpu.memory_space<vmem>>, vector<8x128xf32>
      tpu.vector_store %arg6[%c0_10, %c0_11], %11 {strides = array<i32>} : memref<8x128xf32, #tpu.memory_space<vmem>>, vector<8x128xf32>,
    } else {
    }
    %c0 = arith.constant 0 : index
    %c0_1 = arith.constant 0 : index
    %3 = vector.load %arg6[%c0, %c0_1] : memref<8x128xf32, #tpu.memory_space<vmem>>, vector<8x128xf32>
    %c0_2 = arith.constant 0 : index
    %c0_3 = arith.constant 0 : index
    %4 = vector.load %arg3[%c0_2, %c0_3] : memref<8x128xf32, #tpu.memory_space<vmem>>, vector<8x128xf32>
    %c0_4 = arith.constant 0 : index
    %c0_5 = arith.constant 0 : index
    %5 = vector.load %arg4[%c0_4, %c0_5] : memref<128x128xf32, #tpu.memory_space<vmem>>, vector<128x128xf32>
    %cst = arith.constant dense<0.000000e+00> : vector<8x128xf32>
    %6 = tpu.matmul %4, %5, %cst {dimension_numbers = #tpu.dot_dimension_numbers<[1], [0], [0], [1], [0, 0, 1, 1], [], []>} : vector<8x128xf32>, vector<128x128xf32>, vector<8x128xf32> -> vector<8x128xf32>
    %7 = arith.addf %3, %6 : vector<8x128xf32>
    %c0_6 = arith.constant 0 : index
    %c0_7 = arith.constant 0 : index
    %8 = vector.load %arg6[%c0_6, %c0_7] : memref<8x128xf32, #tpu.memory_space<vmem>>, vector<8x128xf32>
    tpu.vector_store %arg6[%c0_6, %c0_7], %7 {strides = array<i32>} : memref<8x128xf32, #tpu.memory_space<vmem>>, vector<8x128xf32>,
    return
  }
  func.func @transform_0(%arg0: i32, %arg1: i32, %arg2: i32) -> (i32, i32) {
    %c0_i32 = arith.constant 0 : i32
    return %arg0, %arg2 : i32, i32
  }
  func.func @transform_1(%arg0: i32, %arg1: i32, %arg2: i32) -> (i32, i32) {
    %c0_i32 = arith.constant 0 : i32
    return %arg2, %arg1 : i32, i32
  }
  func.func @transform_2(%arg0: i32, %arg1: i32, %arg2: i32) -> (i32, i32) {
    %c0_i32 = arith.constant 0 : i32
    %c0_i32_0 = arith.constant 0 : i32
    return %c0_i32, %arg1 : i32, i32
  }
  func.func @transform_3(%arg0: i32, %arg1: i32, %arg2: i32) -> (i32, i32) {
    %c0_i32 = arith.constant 0 : i32
    return %arg0, %arg1 : i32, i32
  }
}

</mosaic_0001>

<bundles_post_ra>
// kernel: linear_forward.1
= control target key start
LH: loop header
LB: loop body
LE: loop exit
PB: predicated region body
PF: predicated region fallthrough
CT: control target
= control target key end

     0   :  { %8 = vsyncpa [#allocation3], 0  ;;  %s287_s0 = inlined_call_operand.vmem [shape: f32[8,128], index: 0, kind: input, shape index: {}]   ;;  %s288_s1 = inlined_call_operand.hbm [shape: f32[128,128], index: 1, kind: input, shape index: {}]   ;;  %s289_s2 = inlined_call_operand.vmem [shape: f32[1,128], index: 2, kind: input, shape index: {}]   ;;  %s290_s3 = inlined_call_operand.hbm [shape: f32[8,128], index: 3, kind: output, shape index: {}]  }
   0x1   :  { %9 = vsyncpa [#allocation4], 0  ;;  %s249_s12 = smov [#allocation2]  }
   0x2   :  { %s17_s13 = sshll.u32 %s249_s12, 4  ;;  %s18_s13 = int_to_ptr.vmem [resolvable:$true] %s17_s13 }
   0x3   :  { %s213_s14 = scalar_lea.vmem %s18_s13, 2048  ;;  %p218_p1 = scmp.lt.s32.totalorder %s18_s13, %s18_s13 }
   0x4   :  { %p214_p0 = scmp.ne.s32.totalorder %s18_s13, %s213_s14  ;;  %p219_p2 = scmp.lt.s32.totalorder %s213_s14, %s213_s14 }
   0x6   :  { %p220_p3 = por %p219_p2, %p218_p1 }
   0x8   :  { %p221_p4 = pnand %p220_p3, %p214_p0 }
   0xa   :  { %224 = shalt.err (!%p221_p4)
}
   0xb   :  { %s250_s15 = smov 128   ;;  %s251_s16 = smov 8  }
   0xc   :  { %23 = dma.hbm_to_vmem [thread:$0]  %s288_s1, 2048, %s18_s13, [#allocation3], %s250_s15, %s250_s15, %s251_s16  }
   0xd   :  { %245 = dma.done.wait [#allocation3], 2048  }
   0xe   :  { %246 = vsyncadd [#allocation3], 4294965248  ;;  %v252_v0 = vmov 0.0   ;;  %vm253_vm0 = vmmov 0   ;;  %v58_v1 = vld [vmem:[#allocation2 + $0x78] sm:$0xff]  ;;  %v57_v2 = vld [vmem:[#allocation2 + $0x70] sm:$0xff] }
   0xf   :  { %164 = vmatprep.subr.mxu0 %v252_v0  ;;  %196 = vmatprep.mubr.msk.f32.mxu0 %vm253_vm0, %v252_v0  ;;  %v56_v3 = vld [vmem:[#allocation2 + $0x68] sm:$0xff]  ;;  %v55_v4 = vld [vmem:[#allocation2 + $0x60] sm:$0xff]  ;;  %v54_v5 = vld [vmem:[#allocation2 + $0x58] sm:$0xff]  ;;  %s254_s22 = smov [#allocation5]  }
  0x10   :  { %165 = vmatpush3.msra.mxu0 %v58_v1  ;;  %v53_v6 = vld [vmem:[#allocation2 + $0x50] sm:$0xff]  ;;  %v52_v7 = vld [vmem:[#allocation2 + $0x48] sm:$0xff]  ;;  %v51_v8 = vld [vmem:[#allocation2 + $0x40] sm:$0xff]  ;;  %s137_s23 = sshll.u32 %s254_s22, 4  ;;  %s138_s23 = int_to_ptr.vmem [resolvable:$true] %s137_s23 }
  0x11   :  { %166 = vmatprep.subr.mxu0 %v252_v0  ;;  %v50_v9 = vld [vmem:[#allocation2 + $0x38] sm:$0xff]  ;;  %v49_v10 = vld [vmem:[#allocation2 + $0x30] sm:$0xff]  ;;  %v48_v11 = vld [vmem:[#allocation2 + $0x28] sm:$0xff]  ;;  %s225_s24 = scalar_lea.vmem %s138_s23, 128  ;;  %p230_p6 = scmp.lt.s32.totalorder %s138_s23, %s138_s23 }
  0x12   :  { %167 = vmatpush3.msra.mxu0 %v57_v2  ;;  %v47_v12 = vld [vmem:[#allocation2 + $0x20] sm:$0xff]  ;;  %v46_v13 = vld [vmem:[#allocation2 + $0x18] sm:$0xff]  ;;  %v45_v14 = vld [vmem:[#allocation2 + $0x10] sm:$0xff]  ;;  %p226_p5 = scmp.ne.s32.totalorder %s138_s23, %s225_s24  ;;  %p231_p7 = scmp.lt.s32.totalorder %s225_s24, %s225_s24 }
  0x13   :  { %168 = vmatprep.subr.mxu0 %v252_v0  ;;  %v44_v15 = vld [vmem:[#allocation2 + $0x8] sm:$0xff]  ;;  %v43_v16 = vld [vmem:[#allocation2] sm:$0xff] }
  0x14   :  { %169 = vmatpush3.msra.mxu0 %v56_v3  ;;  %v42_v17 = vld [vmem:[%s287_s0] sm:$0xff]  ;;  %p232_p8 = por %p231_p7, %p230_p6 }
  0x15   :  { %170 = vmatprep.subr.mxu0 %v252_v0  ;;  %v146_v18 = vld [vmem:[%s289_s2] ss:$0 sm:$0xff] }
  0x16   :  { %171 = vmatpush3.msra.mxu0 %v55_v4  ;;  %p233_p9 = pnand %p232_p8, %p226_p5 }
  0x17   :  { %172 = vmatprep.subr.mxu0 %v252_v0 }
  0x18   :  { %173 = vmatpush3.msra.mxu0 %v54_v5 }
  0x19   :  { %174 = vmatprep.subr.mxu0 %v252_v0 }
  0x1a   :  { %175 = vmatpush3.msra.mxu0 %v53_v6 }
  0x1b   :  { %176 = vmatprep.subr.mxu0 %v252_v0 }
  0x1c   :  { %177 = vmatpush3.msra.mxu0 %v52_v7 }
  0x1d   :  { %178 = vmatprep.subr.mxu0 %v252_v0 }
  0x1e   :  { %179 = vmatpush3.msra.mxu0 %v51_v8 }
  0x1f   :  { %180 = vmatprep.subr.mxu0 %v252_v0 }
  0x20   :  { %181 = vmatpush3.msra.mxu0 %v50_v9 }
  0x21   :  { %182 = vmatprep.subr.mxu0 %v252_v0 }
  0x22   :  { %183 = vmatpush3.msra.mxu0 %v49_v10 }
  0x23   :  { %184 = vmatprep.subr.mxu0 %v252_v0 }
  0x24   :  { %185 = vmatpush3.msra.mxu0 %v48_v11 }
  0x25   :  { %186 = vmatprep.subr.mxu0 %v252_v0 }
  0x26   :  { %187 = vmatpush3.msra.mxu0 %v47_v12 }
  0x27   :  { %188 = vmatprep.subr.mxu0 %v252_v0 }
  0x28   :  { %189 = vmatpush3.msra.mxu0 %v46_v13 }
  0x29   :  { %190 = vmatprep.subr.mxu0 %v252_v0 }
  0x2a   :  { %191 = vmatpush3.msra.mxu0 %v45_v14 }
  0x2b   :  { %192 = vmatprep.subr.mxu0 %v252_v0 }
  0x2c   :  { %193 = vmatpush3.msra.mxu0 %v44_v15 }
  0x2d   :  { %194 = vmatprep.subr.mxu0 %v252_v0 }
  0x2e   :  { %195 = vmatpush3.msra.mxu0 %v43_v16 }
  0x2f   :  { %197 = vmatmul.mubr.f32.vlgmr.msra.gmra.mxu0 %v42_v17 }
  0xef   :  { %v125_v19 = vpop.f32.mrf.mxu0 }
  0xf0   :  { %v129_v20 = vadd.f32 %v146_v18, %v125_v19 }
  0xf1   :  { %v198_v21 = vpop.f32.mrf.mxu0 }
  0xf2   :  { %130 = vst [vmem:[#allocation5] sm:$0xff] %v129_v20 }
  0xf3   :  { %236 = shalt.err (!%p233_p9)
}
  0xf4   :  { %140 = dma.vmem_to_hbm [thread:$0]  %s138_s23, 128, %s290_s3, [#allocation4]  }
  0xf5   :  { %247 = dma.done.wait [#allocation4], 128  }
  0xf6   :  { %248 = vsyncadd [#allocation4], 4294967168 }
  0xf7   :  { %144 = vsyncpa [#allocation3], 1 }
  0xf8   :  { %145 = vsyncpa [#allocation4], 1 }

</bundles_post_ra>
